<compile_context>
chip_gen: v7x
topology: tpu7x:2x2x1
jax: 0.10.0
libtpu: 0.0.40
codegen_flags: <defaults>
</compile_context>

<pallas_src>
import functools

import jax
import jax.numpy as jnp
from jax.experimental import pallas as pl
from jax.experimental.pallas import tpu as pltpu


def _round_up(x, m):
    return (x + m - 1) // m * m


def _lgc_kernel(occ_ref, adj_ref, feat_ref, ci_ref, out_ref):
    """One (dst_tile, src_tile) step of out = ci * (A @ weighted_feats).

    occ_ref  : SMEM int32[gi*gk]   per-tile adjacency occupancy (scalar prefetch)
    adj_ref  : VMEM bf16[tm, tk]   adjacency tile
    feat_ref : VMEM bf16[tk, d]    cj-weighted source feature tile
    ci_ref   : VMEM f32 [tm, 1]    destination normalization
    out_ref  : VMEM f32 [tm, d]    output tile (VMEM-resident accumulator over k)
    """
    i = pl.program_id(0)
    k = pl.program_id(1)
    nk = pl.num_programs(1)

    @pl.when(k == 0)
    def _():
        out_ref[...] = jnp.zeros_like(out_ref)

    # Skip the matmul entirely for all-zero adjacency tiles (sparse graph).
    @pl.when(occ_ref[i * nk + k] != 0)
    def _():
        out_ref[...] += jnp.dot(adj_ref[...], feat_ref[...],
                                preferred_element_type=jnp.float32)

    @pl.when(k == nk - 1)
    def _():
        out_ref[...] = out_ref[...] * ci_ref[...]


@functools.partial(jax.jit, static_argnames=("tm", "tk"))
def light_graph_conv_pallas(adj, weighted_feats, ci, *, tm=256, tk=512):
    """out = ci * (adj @ weighted_feats), fused & tiled on TPU.

    adj            : (n_dst, n_src) bf16 (0/1 values)
    weighted_feats : (n_src, d)     bf16 (already scaled by cj / dropout)
    ci             : (n_dst, 1)     f32
    returns        : (n_dst, d)     f32
    """
    n_dst, n_src = adj.shape
    _, d = weighted_feats.shape

    # Shrink tiles for small problems; keep lane/sublane-friendly multiples
    # (tk stays a multiple of 256 to fill the v6e/v7x MXU contraction dim).
    tm = min(tm, _round_up(n_dst, 128))
    tk = min(tk, _round_up(n_src, 256))
    d_p = _round_up(d, 128)
    m_p = _round_up(n_dst, tm)
    k_p = _round_up(n_src, tk)

    adj_p = jnp.pad(adj, ((0, m_p - n_dst), (0, k_p - n_src)))
    feat_p = jnp.pad(weighted_feats, ((0, k_p - n_src), (0, d_p - d)))
    ci_p = jnp.pad(ci, ((0, m_p - n_dst), (0, 0)))

    gi, gk = m_p // tm, k_p // tk

    # Per-tile occupancy: 1 iff the (i, k) adjacency tile contains any edge.
    # (For a static graph this should be precomputed once outside the layer.)
    occ = (adj_p.reshape(gi, tm, gk, tk).max(axis=(1, 3)) > 0)
    occ = occ.astype(jnp.int32).reshape(gi * gk)

    out_p = pl.pallas_call(
        _lgc_kernel,
        out_shape=jax.ShapeDtypeStruct((m_p, d_p), jnp.float32),
        grid_spec=pltpu.PrefetchScalarGridSpec(
            num_scalar_prefetch=1,
            grid=(gi, gk),
            in_specs=[
                pl.BlockSpec((tm, tk), lambda i, k, o: (i, k)),    # adjacency tile
                pl.BlockSpec((tk, d_p), lambda i, k, o: (k, 0)),   # weighted feature tile
                pl.BlockSpec((tm, 1), lambda i, k, o: (i, 0)),     # ci tile
            ],
            out_specs=pl.BlockSpec((tm, d_p), lambda i, k, o: (i, 0)),
        ),
        compiler_params=pltpu.CompilerParams(
            dimension_semantics=("parallel", "arbitrary"),
            # Explicit budget: comfortably under v7x's 64 MiB physical VMEM.
            vmem_limit_bytes=48 * 1024 * 1024,
        ),
    )(occ, adj_p, feat_p, ci_p)

    return out_p[:n_dst, :d]


def light_graph_conv(adj, src_feats, cj, ci, *, drop_out=0.1, training=False,
                     rng=None, tm=256, tk=512):
    """Mirrors LightGraphConv.forward for one relation.

    Neighborhood dropout on cj (an (n_src, 1) vector) and the cj feature scaling are
    hoisted out of the kernel (one VPU pass total instead of one per dst row-tile);
    dropout is identity in eval mode, matching nn.Dropout.
    """
    if training:
        keep = 1.0 - drop_out
        mask = jax.random.bernoulli(rng, keep, cj.shape).astype(cj.dtype)
        cj = cj * mask / keep
    weighted = (src_feats * cj).astype(jnp.bfloat16)
    adj_bf16 = adj.astype(jnp.bfloat16)          # 0/1 values -> lossless cast
    return light_graph_conv_pallas(adj_bf16, weighted, ci.astype(jnp.float32),
                                   tm=tm, tk=tk)


def light_gcn_layer(cell_gene_adjs, ufeats, ifeats, *, drop_out=0.1,
                    training=False, rng=None):
    """Mirrors LightGCNLayer.forward (HeteroGraphConv, aggregate='mean').

    cell_gene_adjs : list of dense 0/1 adjacencies, adj[b] has shape (n_cell_b, n_gene)
                     (edge cell_b -> gene; the reverse relation is its transpose)
    ufeats         : list of (n_cell_b, d) cell features
    ifeats         : (n_gene, d) gene features
    returns        : ([new cell feats per batch], new gene feats)
    """
    n_batch = len(cell_gene_adjs)
    gene_msgs, new_ufeats = [], []
    for b in range(n_batch):
        adj_cg = cell_gene_adjs[b]
        # Degree normalizations as DGL stores them: deg ** (-1/2), clamped at 1.
        c_cell = jnp.clip(adj_cg.sum(axis=1, keepdims=True), 1.0, None) ** -0.5
        c_gene = jnp.clip(adj_cg.sum(axis=0, keepdims=True).T, 1.0, None) ** -0.5
        # relation 'exp{b}':          cell_b -> gene  (dst = gene)
        gene_msgs.append(
            light_graph_conv(adj_cg.T, ufeats[b], c_cell, c_gene,
                             drop_out=drop_out, training=training, rng=rng))
        # relation 'reverse-exp{b}':  gene -> cell_b  (dst = cell_b)
        new_ufeats.append(
            light_graph_conv(adj_cg, ifeats, c_gene, c_cell,
                             drop_out=drop_out, training=training, rng=rng))
    # HeteroGraphConv(aggregate='mean'): gene receives from all n_batch relations,
    # each cell type receives from exactly one (mean over one = identity).
    new_ifeats = sum(gene_msgs) / float(n_batch)
    return new_ufeats, new_ifeats


if __name__ == "__main__":
    key = jax.random.PRNGKey(0)
    k1, k2, k3, k4, k5 = jax.random.split(key, 5)

    # Small, deliberately ragged shapes (exercise cdiv padding): 2 cell batches + genes.
    n_cells = [100, 140]
    n_gene = 300
    feat_dim = 96

    adjs = [
        jax.random.bernoulli(k1, 0.05, (n_cells[0], n_gene)).astype(jnp.float32),
        jax.random.bernoulli(k2, 0.05, (n_cells[1], n_gene)).astype(jnp.float32),
    ]
    ufeats = [
        jax.random.normal(k3, (n_cells[0], feat_dim), dtype=jnp.float32),
        jax.random.normal(k4, (n_cells[1], feat_dim), dtype=jnp.float32),
    ]
    ifeats = jax.random.normal(k5, (n_gene, feat_dim), dtype=jnp.float32)

    # Eval-mode forward (dropout identity), matching module inference.
    new_ufeats, new_ifeats = light_gcn_layer(adjs, ufeats, ifeats,
                                             drop_out=0.1, training=False)
    new_ufeats = [jax.block_until_ready(u) for u in new_ufeats]
    new_ifeats = jax.block_until_ready(new_ifeats)

    # Pure-JAX reference of the same (bf16-input, f32-accumulate) computation.
    def ref_conv(adj, feats, cj, ci):
        w = (feats * cj).astype(jnp.bfloat16).astype(jnp.float32)
        return (adj @ w) * ci

    ref_gene_msgs, ref_ufeats = [], []
    for b in range(len(adjs)):
        adj = adjs[b]
        c_cell = jnp.clip(adj.sum(axis=1, keepdims=True), 1.0, None) ** -0.5
        c_gene = jnp.clip(adj.sum(axis=0, keepdims=True).T, 1.0, None) ** -0.5
        ref_gene_msgs.append(ref_conv(adj.T, ufeats[b], c_cell, c_gene))
        ref_ufeats.append(ref_conv(adj, ifeats, c_gene, c_cell))
    ref_ifeats = sum(ref_gene_msgs) / float(len(adjs))

    for b in range(len(adjs)):
        assert new_ufeats[b].shape == (n_cells[b], feat_dim)
        assert jnp.allclose(new_ufeats[b], ref_ufeats[b], atol=1e-3, rtol=1e-3)
    assert new_ifeats.shape == (n_gene, feat_dim)
    assert jnp.allclose(new_ifeats, ref_ifeats, atol=1e-3, rtol=1e-3)

    print("KERNEL_OK")
</pallas_src>

<mosaic_0001>
module attributes {stable_mosaic.version = 11 : i64} {
  func.func @_lgc_kernel(%arg0: i32, %arg1: i32, %arg2: memref<2xi32, #tpu.memory_space<smem>>, %arg3: memref<256x256xbf16, #tpu.memory_space<vmem>>, %arg4: memref<256x128xbf16, #tpu.memory_space<vmem>>, %arg5: memref<256x1xf32, #tpu.memory_space<vmem>>, %arg6: memref<256x128xf32, #tpu.memory_space<vmem>>) attributes {dimension_semantics = [#tpu.dimension_semantics<parallel>, #tpu.dimension_semantics<arbitrary>], iteration_bounds = array<i64: 2, 1>, scalar_prefetch = 1 : i64, scratch_operands = 0 : i64, tpu.core_type = #tpu.core_type<tc>, window_params = [{transform_indices = @transform_0, window_bounds = array<i64: 256, 256>}, {transform_indices = @transform_1, window_bounds = array<i64: 256, 128>}, {transform_indices = @transform_2, window_bounds = array<i64: 256, 1>}, {transform_indices = @transform_3, window_bounds = array<i64: 256, 128>}]} {
    %c0_i32 = arith.constant 0 : i32
    %0 = arith.cmpi eq, %arg1, %c0_i32 : i32
    %1 = arith.extui %0 : i1 to i32
    %c0_i32_0 = arith.constant 0 : i32
    %2 = arith.cmpi ne, %1, %c0_i32_0 : i32
    scf.if %2 {
      %cst = arith.constant 0.000000e+00 : f32
      %13 = vector.broadcast %cst : f32 to vector<256x128xf32>
      %c0 = arith.constant 0 : index
      %c0_5 = arith.constant 0 : index
      %14 = vector.load %arg6[%c0, %c0_5] : memref<256x128xf32, #tpu.memory_space<vmem>>, vector<256x128xf32>
      tpu.vector_store %arg6[%c0, %c0_5], %13 {strides = array<i32>} : memref<256x128xf32, #tpu.memory_space<vmem>>, vector<256x128xf32>,
    } else {
    }
    %c1_i32 = arith.constant 1 : i32
    %3 = arith.muli %arg0, %c1_i32 : i32
    %4 = arith.addi %3, %arg1 : i32
    %5 = arith.index_cast %4 : i32 to index
    %6 = memref.load %arg2[%5] : memref<2xi32, #tpu.memory_space<smem>>
    %c0_i32_1 = arith.constant 0 : i32
    %7 = arith.cmpi ne, %6, %c0_i32_1 : i32
    %8 = arith.extui %7 : i1 to i32
    %c0_i32_2 = arith.constant 0 : i32
    %9 = arith.cmpi ne, %8, %c0_i32_2 : i32
    scf.if %9 {
      %c0 = arith.constant 0 : index
      %c0_5 = arith.constant 0 : index
      %13 = vector.load %arg6[%c0, %c0_5] : memref<256x128xf32, #tpu.memory_space<vmem>>, vector<256x128xf32>
      %c0_6 = arith.constant 0 : index
      %c0_7 = arith.constant 0 : index
      %14 = vector.load %arg3[%c0_6, %c0_7] : memref<256x256xbf16, #tpu.memory_space<vmem>>, vector<256x256xbf16>
      %c0_8 = arith.constant 0 : index
      %c0_9 = arith.constant 0 : index
      %15 = vector.load %arg4[%c0_8, %c0_9] : memref<256x128xbf16, #tpu.memory_space<vmem>>, vector<256x128xbf16>
      %cst = arith.constant dense<0.000000e+00> : vector<256x128xf32>
      %16 = tpu.matmul %14, %15, %cst {dimension_numbers = #tpu.dot_dimension_numbers<[1], [0], [0], [1], [0, 0, 1, 1], [], []>} : vector<256x256xbf16>, vector<256x128xbf16>, vector<256x128xf32> -> vector<256x128xf32>
      %17 = arith.addf %13, %16 : vector<256x128xf32>
      %c0_10 = arith.constant 0 : index
      %c0_11 = arith.constant 0 : index
      %18 = vector.load %arg6[%c0_10, %c0_11] : memref<256x128xf32, #tpu.memory_space<vmem>>, vector<256x128xf32>
      tpu.vector_store %arg6[%c0_10, %c0_11], %17 {strides = array<i32>} : memref<256x128xf32, #tpu.memory_space<vmem>>, vector<256x128xf32>,
    } else {
    }
    %c0_i32_3 = arith.constant 0 : i32
    %10 = arith.cmpi eq, %arg1, %c0_i32_3 : i32
    %11 = arith.extui %10 : i1 to i32
    %c0_i32_4 = arith.constant 0 : i32
    %12 = arith.cmpi ne, %11, %c0_i32_4 : i32
    scf.if %12 {
      %c0 = arith.constant 0 : index
      %c0_5 = arith.constant 0 : index
      %13 = vector.load %arg6[%c0, %c0_5] : memref<256x128xf32, #tpu.memory_space<vmem>>, vector<256x128xf32>
      %c0_6 = arith.constant 0 : index
      %c0_7 = arith.constant 0 : index
      %14 = vector.load %arg5[%c0_6, %c0_7] : memref<256x1xf32, #tpu.memory_space<vmem>>, vector<256x1xf32>
      %15 = vector.broadcast %14 : vector<256x1xf32> to vector<256x128xf32>
      %16 = arith.mulf %13, %15 : vector<256x128xf32>
      %c0_8 = arith.constant 0 : index
      %c0_9 = arith.constant 0 : index
      %17 = vector.load %arg6[%c0_8, %c0_9] : memref<256x128xf32, #tpu.memory_space<vmem>>, vector<256x128xf32>
      tpu.vector_store %arg6[%c0_8, %c0_9], %16 {strides = array<i32>} : memref<256x128xf32, #tpu.memory_space<vmem>>, vector<256x128xf32>,
    } else {
    }
    return
  }
  func.func @transform_0(%arg0: i32, %arg1: i32, %arg2: memref<2xi32, #tpu.memory_space<smem>>) -> (i32, i32) {
    %c0_i32 = arith.constant 0 : i32
    return %arg0, %arg1 : i32, i32
  }
  func.func @transform_1(%arg0: i32, %arg1: i32, %arg2: memref<2xi32, #tpu.memory_space<smem>>) -> (i32, i32) {
    %c0_i32 = arith.constant 0 : i32
    %c0_i32_0 = arith.constant 0 : i32
    return %arg1, %c0_i32 : i32, i32
  }
  func.func @transform_2(%arg0: i32, %arg1: i32, %arg2: memref<2xi32, #tpu.memory_space<smem>>) -> (i32, i32) {
    %c0_i32 = arith.constant 0 : i32
    %c0_i32_0 = arith.constant 0 : i32
    return %arg0, %c0_i32 : i32, i32
  }
  func.func @transform_3(%arg0: i32, %arg1: i32, %arg2: memref<2xi32, #tpu.memory_space<smem>>) -> (i32, i32) {
    %c0_i32 = arith.constant 0 : i32
    %c0_i32_0 = arith.constant 0 : i32
    return %arg0, %c0_i32 : i32, i32
  }
}

</mosaic_0001>

<bundles_post_ra>
// kernel: light_graph_conv_pallas.1
= control target key start
LH: loop header
LB: loop body
LE: loop exit
PB: predicated region body
PF: predicated region fallthrough
CT: control target
= control target key end

     0   :  { %s1937_s0 = inlined_call_operand.vmem [shape: s32[2], index: 0, kind: input, shape index: {}]   ;;  %s1938_s1 = inlined_call_operand.vmem [shape: bf16[512,256], index: 1, kind: input, shape index: {}]   ;;  %s1939_s2 = inlined_call_operand.vmem [shape: bf16[256,128], index: 2, kind: input, shape index: {}]   ;;  %s1940_s3 = inlined_call_operand.vmem [shape: f32[512,1], index: 3, kind: input, shape index: {}]   ;;  %s1941_s4 = inlined_call_operand.vmem [shape: f32[512,128], index: 4, kind: output, shape index: {}]  }
   0x1   :  { %s9_s17 = sshll.u32 %s1937_s0, 4  ;;  %s10_s17 = int_to_ptr.vmem [resolvable:$true] %s9_s17 }
   0x2   :  { %s1551_s18 = scalar_lea.vmem %s10_s17, 16  ;;  %p1556_p1 = scmp.lt.s32.totalorder %s10_s17, %s10_s17 }
   0x3   :  { %p1552_p0 = scmp.ne.s32.totalorder %s10_s17, %s1551_s18  ;;  %p1557_p2 = scmp.lt.s32.totalorder %s1551_s18, %s1551_s18 }
   0x5   :  { %p1558_p3 = por %p1557_p2, %p1556_p1 }
   0x7   :  { %p1559_p4 = pnand %p1558_p3, %p1552_p0 }
   0x9   :  { %1562 = shalt.err (!%p1559_p4)  }
   0xa   :  { %s1589_s19 = smov [#allocation3]  }
   0xb   :  { %12 = dma.vmem_to_smem %s10_s17, 16, %s1589_s19, [#allocation2] }
   0xc   :  { %1575 = dma.done.wait [#allocation2], 16 }
   0xd   :  { %1576 = vsyncadd [#allocation2], 4294967280 }
   0xe   :  { %14 = sfence }
   0xf   :  { %s1620_s20 = smov 0   ;;  %s1622_s21 = smov 0  }
  0x10   :  { %s1624_s22 = smov 0  }
  0x11 LB: > { %s32_s0 = sadd.s32 1, %s1583_s21  ;;  %p1270_p5 = scmp.ge.s32.totalorder %s1587_s22, 1  ;;  %s1587_s22 = sphi %s1624_s22, %s20_s22   ;;  %s1583_s21 = sphi %s1622_s21, %s1943_s21   ;;  %s1579_s20 = sphi %s1620_s20, %s1942_s20  }
  0x12   : > { %p34_p6 = scmp.ge.s32.totalorder %s32_s0, 2  ;;  %p187_p7 = scmp.lt.s32.totalorder %s1587_s22, 3 }
  0x14   : > { %s1945_s0 = smov (%p34_p6, %s32_s0), 0  ;;  %p188_p8 = pnand %p1270_p5, %p187_p7 }
  0x15   : > { %s1271_s23 = sshll.u32 (!%p188_p8), %s1579_s20, 5  ;;  %s1638_s24 = sld [smem:[#allocation3 + %s1579_s20]] (!%p188_p8)  ;;  %v1590_v0 = vmov (!%p188_p8), 0.0  }
  0x16   : > { %191 = sbr.rel (%p188_p8) target bundleno = 531 (0x213), region = 32  ;;  %p228_p9 = scmp.lt.s32.totalorder (!%p188_p8), %s1271_s23, 63 }
  0x1b   : > { %p1278_p10 = scmp.eq.s32.totalorder (!%p188_p8), %s1638_s24, 0 }
  0x1d   : > { %s1947_s23 = smov (!%p228_p9, %s1271_s23), 63  ;;  %v1485_v1 = vld [vmem:[%s1939_s2 + $0x40] sm:$0xff] (!%p1278_p10)   ;;  %v1487_v3 = vld [vmem:[%s1939_s2 + $0x48] sm:$0xff] (!%p1278_p10)   ;;  %v1489_v5 = vld [vmem:[%s1939_s2 + $0x50] sm:$0xff] (!%p1278_p10)  }
  0x1e   : > { %s1329_s25 = sshll.u32 %s1947_s23, 3  ;;  %v1486_v2 = vld [vmem:[%s1939_s2] sm:$0xff] (!%p1278_p10)   ;;  %1330 = vmatprep.subr.bf16.mxu0 (!%p1278_p10), %v1485_v1  ;;  %1442 = vmatprep.subr.bf16.mxu1 (!%p1278_p10), %v1485_v1  ;;  %v1488_v4 = vld [vmem:[%s1939_s2 + $0x8] sm:$0xff] (!%p1278_p10)   ;;  %v1490_v6 = vld [vmem:[%s1939_s2 + $0x10] sm:$0xff] (!%p1278_p10)  }
  0x1f   : > { %s1643_s28 = scalar_lea.vmem %s1938_s1, %s1329_s25  ;;  %s1648_s5 = scalar_lea.vmem %s1940_s3, %s1329_s25  ;;  %1331 = vmatpush3.bf16.msra.mxu0 (!%p1278_p10), %v1486_v2  ;;  %1450 = vmatpush3.bf16.msra.mxu1 (!%p1278_p10), %v1486_v2  ;;  %v1491_v7 = vld [vmem:[%s1939_s2 + $0x58] sm:$0xff] (!%p1278_p10)   ;;  %v1493_v9 = vld [vmem:[%s1939_s2 + $0x60] sm:$0xff] (!%p1278_p10)   ;;  %v1495_v11 = vld [vmem:[%s1939_s2 + $0x68] sm:$0xff] (!%p1278_p10)  }
  0x20   : > { %s1653_s8 = scalar_lea.vmem %s1941_s4, %s1329_s25  ;;  %1332 = vmatprep.subr.bf16.mxu0 (!%p1278_p10), %v1487_v3  ;;  %1443 = vmatprep.subr.bf16.mxu1 (!%p1278_p10), %v1487_v3  ;;  %v1492_v8 = vld [vmem:[%s1939_s2 + $0x18] sm:$0xff] (!%p1278_p10)   ;;  %v1494_v10 = vld [vmem:[%s1939_s2 + $0x20] sm:$0xff] (!%p1278_p10)   ;;  %v1496_v14 = vld [vmem:[%s1939_s2 + $0x28] sm:$0xff] (!%p1278_p10)  }
  0x21   : > { %261 = vst [vmem:[%s1653_s8] sm:$0xff] %v1590_v0  ;;  %262 = vst [vmem:[%s1653_s8 + $0x8] sm:$0xff] %v1590_v0  ;;  %v1503_v12 = vld [vmem:[%s1643_s28 + $0x4] ss:$8 sps:$4 sm:$0xff] (!%p1278_p10)   ;;  %v1497_v15 = vld [vmem:[%s1939_s2 + $0x70] sm:$0xff] (!%p1278_p10)  }
  0x22   : > { %263 = vst [vmem:[%s1653_s8 + $0x10] sm:$0xff] %v1590_v0  ;;  %264 = vst [vmem:[%s1653_s8 + $0x18] sm:$0xff] %v1590_v0  ;;  %v1506_v13 = vld [vmem:[%s1643_s28 + $0x84] ss:$8 sps:$4 sm:$0xff] (!%p1278_p10)   ;;  %683 = vmatprep.mubr.bf16.mxu0 (!%p1278_p10), %v1503_v12  ;;  %v1498_v16 = vld [vmem:[%s1939_s2 + $0x30] sm:$0xff] (!%p1278_p10)  }
  0x23   : > { %265 = vst [vmem:[%s1653_s8 + $0x20] sm:$0xff] %v1590_v0  ;;  %266 = vst [vmem:[%s1653_s8 + $0x28] sm:$0xff] %v1590_v0  ;;  %1333 = vmatpush3.bf16.msra.mxu0 (!%p1278_p10), %v1488_v4  ;;  %1451 = vmatpush3.bf16.msra.mxu1 (!%p1278_p10), %v1488_v4  ;;  %v1499_v17 = vld [vmem:[%s1939_s2 + $0x78] sm:$0xff] (!%p1278_p10)   ;;  %v1501_v19 = vld [vmem:[%s1643_s28] ss:$8 sps:$4 sm:$0xff] (!%p1278_p10)  }
  0x24   : > { %267 = vst [vmem:[%s1653_s8 + $0x30] sm:$0xff] %v1590_v0  ;;  %268 = vst [vmem:[%s1653_s8 + $0x38] sm:$0xff] %v1590_v0  ;;  %1334 = vmatprep.subr.bf16.mxu0 (!%p1278_p10), %v1489_v5  ;;  %1444 = vmatprep.subr.bf16.mxu1 (!%p1278_p10), %v1489_v5  ;;  %v1500_v18 = vld [vmem:[%s1939_s2 + $0x38] sm:$0xff] (!%p1278_p10)   ;;  %v1504_v20 = vld [vmem:[%s1643_s28 + $0x80] ss:$8 sps:$4 sm:$0xff] (!%p1278_p10)  }
  0x25   : > { %269 = vst [vmem:[%s1653_s8 + $0x40] sm:$0xff] %v1590_v0  ;;  %270 = vst [vmem:[%s1653_s8 + $0x48] sm:$0xff] %v1590_v0  ;;  %747 = vmatprep.mubr.bf16.mxu1 (!%p1278_p10), %v1506_v13  ;;  %v1507_v21 = vld [vmem:[%s1643_s28 + $0x14] ss:$8 sps:$4 sm:$0xff] (!%p1278_p10)   ;;  %v1511_v23 = vld [vmem:[%s1643_s28 + $0x10] ss:$8 sps:$4 sm:$0xff] (!%p1278_p10)  }
  0x26   : > { %271 = vst [vmem:[%s1653_s8 + $0x50] sm:$0xff] %v1590_v0  ;;  %272 = vst [vmem:[%s1653_s8 + $0x58] sm:$0xff] %v1590_v0  ;;  %v1509_v22 = vld [vmem:[%s1643_s28 + $0x94] ss:$8 sps:$4 sm:$0xff] (!%p1278_p10)   ;;  %v1512_v24 = vld [vmem:[%s1643_s28 + $0x90] ss:$8 sps:$4 sm:$0xff] (!%p1278_p10)  }
  0x27   : > { %273 = vst [vmem:[%s1653_s8 + $0x60] sm:$0xff] %v1590_v0  ;;  %274 = vst [vmem:[%s1653_s8 + $0x68] sm:$0xff] %v1590_v0  ;;  %1335 = vmatpush3.bf16.msra.mxu0 (!%p1278_p10), %v1490_v6  ;;  %1452 = vmatpush3.bf16.msra.mxu1 (!%p1278_p10), %v1490_v6  ;;  %v1513_v25 = vld [vmem:[%s1643_s28 + $0x24] ss:$8 sps:$4 sm:$0xff] (!%p1278_p10)   ;;  %v1517_v27 = vld [vmem:[%s1643_s28 + $0x20] ss:$8 sps:$4 sm:$0xff] (!%p1278_p10)  }
  0x28   : > { %275 = vst [vmem:[%s1653_s8 + $0x70] sm:$0xff] %v1590_v0  ;;  %276 = vst [vmem:[%s1653_s8 + $0x78] sm:$0xff] %v1590_v0  ;;  %1336 = vmatprep.subr.bf16.mxu0 (!%p1278_p10), %v1491_v7  ;;  %1445 = vmatprep.subr.bf16.mxu1 (!%p1278_p10), %v1491_v7  ;;  %v1515_v26 = vld [vmem:[%s1643_s28 + $0xa4] ss:$8 sps:$4 sm:$0xff] (!%p1278_p10)   ;;  %v1518_v28 = vld [vmem:[%s1643_s28 + $0xa0] ss:$8 sps:$4 sm:$0xff] (!%p1278_p10)  }
  0x29   : > { %277 = vst [vmem:[%s1653_s8 + $0x80] sm:$0xff] %v1590_v0  ;;  %278 = vst [vmem:[%s1653_s8 + $0x88] sm:$0xff] %v1590_v0  ;;  %v1519_v29 = vld [vmem:[%s1643_s28 + $0x34] ss:$8 sps:$4 sm:$0xff] (!%p1278_p10)   ;;  %v1523_v31 = vld [vmem:[%s1643_s28 + $0x30] ss:$8 sps:$4 sm:$0xff] (!%p1278_p10)  }
  0x2a   : > { %279 = vst [vmem:[%s1653_s8 + $0x90] sm:$0xff] %v1590_v0  ;;  %280 = vst [vmem:[%s1653_s8 + $0x98] sm:$0xff] %v1590_v0  ;;  %298 = sbr.rel (%p1278_p10) target bundleno = 338 (0x152), region = 40  ;;  %v1521_v30 = vld [vmem:[%s1643_s28 + $0xb4] ss:$8 sps:$4 sm:$0xff] (!%p1278_p10)   ;;  %v299_v51 = vld [vmem:[%s1653_s8] sm:$0xff] (!%p1278_p10) }
  0x2b   : > { %281 = vst [vmem:[%s1653_s8 + $0xa0] sm:$0xff] %v1590_v0  ;;  %282 = vst [vmem:[%s1653_s8 + $0xa8] sm:$0xff] %v1590_v0  ;;  %1337 = vmatpush3.bf16.msra.mxu0 (!%p1278_p10), %v1492_v8  ;;  %1453 = vmatpush3.bf16.msra.mxu1 (!%p1278_p10), %v1492_v8  ;;  %v1524_v32 = vld [vmem:[%s1643_s28 + $0xb0] ss:$8 sps:$4 sm:$0xff] (!%p1278_p10)   ;;  %v1525_v33 = vld [vmem:[%s1643_s28 + $0x44] ss:$8 sps:$4 sm:$0xff] (!%p1278_p10)  }
  0x2c   : > { %283 = vst [vmem:[%s1653_s8 + $0xb0] sm:$0xff] %v1590_v0  ;;  %284 = vst [vmem:[%s1653_s8 + $0xb8] sm:$0xff] %v1590_v0  ;;  %1338 = vmatprep.subr.bf16.mxu0 (!%p1278_p10), %v1493_v9  ;;  %1446 = vmatprep.subr.bf16.mxu1 (!%p1278_p10), %v1493_v9  ;;  %v1527_v34 = vld [vmem:[%s1643_s28 + $0xc4] ss:$8 sps:$4 sm:$0xff] (!%p1278_p10)   ;;  %v1529_v35 = vld [vmem:[%s1643_s28 + $0x40] ss:$8 sps:$4 sm:$0xff] (!%p1278_p10)  }
  0x2d   : > { %285 = vst [vmem:[%s1653_s8 + $0xc0] sm:$0xff] %v1590_v0  ;;  %286 = vst [vmem:[%s1653_s8 + $0xc8] sm:$0xff] %v1590_v0  ;;  %v1530_v36 = vld [vmem:[%s1643_s28 + $0xc0] ss:$8 sps:$4 sm:$0xff] (!%p1278_p10)   ;;  %v1531_v37 = vld [vmem:[%s1643_s28 + $0x54] ss:$8 sps:$4 sm:$0xff] (!%p1278_p10)  }
  0x2e   : > { %287 = vst [vmem:[%s1653_s8 + $0xd0] sm:$0xff] %v1590_v0  ;;  %288 = vst [vmem:[%s1653_s8 + $0xd8] sm:$0xff] %v1590_v0  ;;  %v1533_v38 = vld [vmem:[%s1643_s28 + $0xd4] ss:$8 sps:$4 sm:$0xff] (!%p1278_p10)   ;;  %v1535_v39 = vld [vmem:[%s1643_s28 + $0x50] ss:$8 sps:$4 sm:$0xff] (!%p1278_p10)  }
  0x2f   : > { %289 = vst [vmem:[%s1653_s8 + $0xe0] sm:$0xff] %v1590_v0  ;;  %290 = vst [vmem:[%s1653_s8 + $0xe8] sm:$0xff] %v1590_v0  ;;  %1339 = vmatpush3.bf16.msra.mxu0 (!%p1278_p10), %v1494_v10  ;;  %1454 = vmatpush3.bf16.msra.mxu1 (!%p1278_p10), %v1494_v10  ;;  %v1536_v40 = vld [vmem:[%s1643_s28 + $0xd0] ss:$8 sps:$4 sm:$0xff] (!%p1278_p10)   ;;  %v1537_v41 = vld [vmem:[%s1643_s28 + $0x64] ss:$8 sps:$4 sm:$0xff] (!%p1278_p10)  }
  0x30   : > { %291 = vst [vmem:[%s1653_s8 + $0xf0] sm:$0xff] %v1590_v0  ;;  %292 = vst [vmem:[%s1653_s8 + $0xf8] sm:$0xff] %v1590_v0  ;;  %1340 = vmatprep.subr.bf16.mxu0 (!%p1278_p10), %v1495_v11  ;;  %1447 = vmatprep.subr.bf16.mxu1 (!%p1278_p10), %v1495_v11  ;;  %v1539_v42 = vld [vmem:[%s1643_s28 + $0xe4] ss:$8 sps:$4 sm:$0xff] (!%p1278_p10)   ;;  %v1541_v43 = vld [vmem:[%s1643_s28 + $0x60] ss:$8 sps:$4 sm:$0xff] (!%p1278_p10)  }
  0x31   : > { %v1542_v44 = vld [vmem:[%s1643_s28 + $0xe0] ss:$8 sps:$4 sm:$0xff]   ;;  %v1543_v45 = vld [vmem:[%s1643_s28 + $0x74] ss:$8 sps:$4 sm:$0xff]   ;;  %v1547_v47 = vld [vmem:[%s1643_s28 + $0x70] ss:$8 sps:$4 sm:$0xff]  }
  0x32   : > { %v1545_v46 = vld [vmem:[%s1643_s28 + $0xf4] ss:$8 sps:$4 sm:$0xff]   ;;  %v1548_v48 = vld [vmem:[%s1643_s28 + $0xf0] ss:$8 sps:$4 sm:$0xff]   ;;  %v315_v53 = vld [vmem:[%s1653_s8 + $0x80] sm:$0xff] }
  0x33   : > { %1341 = vmatpush3.bf16.msra.mxu0 %v1496_v14  ;;  %1455 = vmatpush3.bf16.msra.mxu1 %v1496_v14  ;;  %v300_v59 = vld [vmem:[%s1653_s8 + $0x8] sm:$0xff]  ;;  %v301_v7 = vld [vmem:[%s1653_s8 + $0x10] sm:$0xff] }
  0x34   : > { %1342 = vmatprep.subr.bf16.mxu0 %v1497_v15  ;;  %1448 = vmatprep.subr.bf16.mxu1 %v1497_v15  ;;  %v316_v61 = vld [vmem:[%s1653_s8 + $0x88] sm:$0xff]  ;;  %v317_v9 = vld [vmem:[%s1653_s8 + $0x90] sm:$0xff]  ;;  %v302_v15 = vld [vmem:[%s1653_s8 + $0x18] sm:$0xff] }
  0x37   : > { %1343 = vmatpush3.bf16.msra.mxu0 %v1498_v16  ;;  %1456 = vmatpush3.bf16.msra.mxu1 %v1498_v16 }
  0x38   : > { %1344 = vmatprep.subr.bf16.mxu0 %v1499_v17  ;;  %1449 = vmatprep.subr.bf16.mxu1 %v1499_v17  ;;  %v318_v17 = vld [vmem:[%s1653_s8 + $0x98] sm:$0xff] }
  0x3b   : > { %1345 = vmatpush3.bf16.msra.mxu0 %v1500_v18  ;;  %1457 = vmatpush3.bf16.msra.mxu1 %v1500_v18 }
  0x3e   : > { %684 = vmatmul.mubr.bf16.vlgmr.msra.gmra.mrb[0].mxu0 %v1501_v19  ;;  %748 = vmatmul.mubr.bf16.vlgmr.msra.gmra.mrb[0].mxu1 %v1504_v20 }
  0x3f   : > { %691 = vmatprep.mubr.bf16.mxu0 %v1507_v21  ;;  %755 = vmatprep.mubr.bf16.mxu1 %v1509_v22 }
  0x46   : > { %692 = vmatmul.mubr.bf16.gmra.mrb[4].mxu0 %v1511_v23  ;;  %756 = vmatmul.mubr.bf16.gmra.mrb[4].mxu1 %v1512_v24 }
  0x47   : > { %699 = vmatprep.mubr.bf16.mxu0 %v1513_v25  ;;  %763 = vmatprep.mubr.bf16.mxu1 %v1515_v26 }
  0x4e   : > { %700 = vmatmul.mubr.bf16.gmra.mrb[8].mxu0 %v1517_v27  ;;  %764 = vmatmul.mubr.bf16.gmra.mrb[8].mxu1 %v1518_v28  ;;  %v303_v27 = vld [vmem:[%s1653_s8 + $0x20] sm:$0xff] }
  0x4f   : > { %707 = vmatprep.mubr.bf16.mxu0 %v1519_v29  ;;  %771 = vmatprep.mubr.bf16.mxu1 %v1521_v30  ;;  %v319_v29 = vld [vmem:[%s1653_s8 + $0xa0] sm:$0xff] }
  0x56   : > { %708 = vmatmul.mubr.bf16.gmra.mrb[12].mxu0 %v1523_v31  ;;  %772 = vmatmul.mubr.bf16.gmra.mrb[12].mxu1 %v1524_v32 }
  0x57   : > { %715 = vmatprep.mubr.bf16.mxu0 %v1525_v33  ;;  %779 = vmatprep.mubr.bf16.mxu1 %v1527_v34 }
  0x5e   : > { %716 = vmatmul.mubr.bf16.gmra.mrb[16].mxu0 %v1529_v35  ;;  %780 = vmatmul.mubr.bf16.gmra.mrb[16].mxu1 %v1530_v36  ;;  %v304_v35 = vld [vmem:[%s1653_s8 + $0x28] sm:$0xff] }
  0x5f   : > { %723 = vmatprep.mubr.bf16.mxu0 %v1531_v37  ;;  %787 = vmatprep.mubr.bf16.mxu1 %v1533_v38  ;;  %v320_v37 = vld [vmem:[%s1653_s8 + $0xa8] sm:$0xff] }
  0x66   : > { %724 = vmatmul.mubr.bf16.gmra.mrb[20].mxu0 %v1535_v39  ;;  %788 = vmatmul.mubr.bf16.gmra.mrb[20].mxu1 %v1536_v40 }
  0x67   : > { %731 = vmatprep.mubr.bf16.mxu0 %v1537_v41  ;;  %795 = vmatprep.mubr.bf16.mxu1 %v1539_v42 }
  0x6e   : > { %732 = vmatmul.mubr.bf16.gmra.mrb[24].mxu0 %v1541_v43  ;;  %796 = vmatmul.mubr.bf16.gmra.mrb[24].mxu1 %v1542_v44 }
  0x6f   : > { %739 = vmatprep.mubr.bf16.mxu0 %v1543_v45  ;;  %803 = vmatprep.mubr.bf16.mxu1 %v1545_v46 }
  0x76   : > { %740 = vmatmul.mubr.bf16.gmra.mrb[28].mxu0 %v1547_v47  ;;  %804 = vmatmul.mubr.bf16.gmra.mrb[28].mxu1 %v1548_v48  ;;  %v305_v47 = vld [vmem:[%s1653_s8 + $0x30] sm:$0xff] }
 0x111   : > { %v1346_v49 = vpop.f32.mrb[0].mxu0  ;;  %v1394_v50 = vpop.f32.mrb[0].mxu1 }
 0x112   : > { %v1347_v52 = vpop.f32.mrb[1].mxu0  ;;  %v1395_v54 = vpop.f32.mrb[1].mxu1 }
 0x113   : > { %v1348_v55 = vadd.f32 %v1347_v52, %v1346_v49  ;;  %v1396_v56 = vadd.f32 %v1395_v54, %v1394_v50  ;;  %v1349_v57 = vpop.f32.mrb[2].mxu0  ;;  %v1397_v58 = vpop.f32.mrb[2].mxu1  ;;  %v321_v49 = vld [vmem:[%s1653_s8 + $0xb0] sm:$0xff] }
 0x114   : > { %v1350_v60 = vpop.f32.mrb[3].mxu0  ;;  %v1398_v62 = vpop.f32.mrb[3].mxu1 }
 0x115   : > { %v812_v63 = vadd.f32 %v1348_v55, %v299_v51  ;;  %v828_v0 = vadd.f32 %v1396_v56, %v315_v53  ;;  %v1351_v1 = vadd.f32 %v1350_v60, %v1349_v57  ;;  %v1399_v2 = vadd.f32 %v1398_v62, %v1397_v58  ;;  %v306_v55 = vld [vmem:[%s1653_s8 + $0x38] sm:$0xff] }
 0x116   : > { %v322_v57 = vld [vmem:[%s1653_s8 + $0xb8] sm:$0xff] }
 0x117   : > { %844 = vst [vmem:[%s1653_s8] sm:$0xff] %v812_v63  ;;  %860 = vst [vmem:[%s1653_s8 + $0x80] sm:$0xff] %v828_v0  ;;  %v813_v3 = vadd.f32 %v1351_v1, %v300_v59  ;;  %v829_v4 = vadd.f32 %v1399_v2, %v316_v61 }
 0x119   : > { %845 = vst [vmem:[%s1653_s8 + $0x8] sm:$0xff] %v813_v3  ;;  %861 = vst [vmem:[%s1653_s8 + $0x88] sm:$0xff] %v829_v4  ;;  %v1352_v5 = vpop.f32.mrb[4].mxu0  ;;  %v1400_v6 = vpop.f32.mrb[4].mxu1  ;;  %v307_v3 = vld [vmem:[%s1653_s8 + $0x40] sm:$0xff] }
 0x11a   : > { %v1353_v8 = vpop.f32.mrb[5].mxu0  ;;  %v1401_v10 = vpop.f32.mrb[5].mxu1 }
 0x11b   : > { %v1354_v11 = vadd.f32 %v1353_v8, %v1352_v5  ;;  %v1402_v12 = vadd.f32 %v1401_v10, %v1400_v6  ;;  %v1355_v13 = vpop.f32.mrb[6].mxu0  ;;  %v1403_v14 = vpop.f32.mrb[6].mxu1  ;;  %v323_v5 = vld [vmem:[%s1653_s8 + $0xc0] sm:$0xff] }
 0x11c   : > { %v1356_v16 = vpop.f32.mrb[7].mxu0  ;;  %v1404_v18 = vpop.f32.mrb[7].mxu1 }
 0x11d   : > { %v814_v19 = vadd.f32 %v1354_v11, %v301_v7  ;;  %v830_v20 = vadd.f32 %v1402_v12, %v317_v9  ;;  %v1357_v21 = vadd.f32 %v1356_v16, %v1355_v13  ;;  %v1405_v22 = vadd.f32 %v1404_v18, %v1403_v14  ;;  %v308_v11 = vld [vmem:[%s1653_s8 + $0x48] sm:$0xff] }
 0x11e   : > { %v324_v13 = vld [vmem:[%s1653_s8 + $0xc8] sm:$0xff] }
 0x11f   : > { %846 = vst [vmem:[%s1653_s8 + $0x10] sm:$0xff] %v814_v19  ;;  %862 = vst [vmem:[%s1653_s8 + $0x90] sm:$0xff] %v830_v20  ;;  %v815_v23 = vadd.f32 %v1357_v21, %v302_v15  ;;  %v831_v24 = vadd.f32 %v1405_v22, %v318_v17 }
 0x121   : > { %847 = vst [vmem:[%s1653_s8 + $0x18] sm:$0xff] %v815_v23  ;;  %863 = vst [vmem:[%s1653_s8 + $0x98] sm:$0xff] %v831_v24  ;;  %v1358_v25 = vpop.f32.mrb[8].mxu0  ;;  %v1406_v26 = vpop.f32.mrb[8].mxu1  ;;  %v309_v23 = vld [vmem:[%s1653_s8 + $0x50] sm:$0xff] }
 0x122   : > { %v1359_v28 = vpop.f32.mrb[9].mxu0  ;;  %v1407_v30 = vpop.f32.mrb[9].mxu1 }
 0x123   : > { %v1360_v31 = vadd.f32 %v1359_v28, %v1358_v25  ;;  %v1408_v32 = vadd.f32 %v1407_v30, %v1406_v26  ;;  %v1361_v33 = vpop.f32.mrb[10].mxu0  ;;  %v1409_v34 = vpop.f32.mrb[10].mxu1  ;;  %v325_v25 = vld [vmem:[%s1653_s8 + $0xd0] sm:$0xff] }
 0x124   : > { %v1362_v36 = vpop.f32.mrb[11].mxu0  ;;  %v1410_v38 = vpop.f32.mrb[11].mxu1 }
 0x125   : > { %v816_v39 = vadd.f32 %v1360_v31, %v303_v27  ;;  %v832_v40 = vadd.f32 %v1408_v32, %v319_v29  ;;  %v1363_v41 = vadd.f32 %v1362_v36, %v1361_v33  ;;  %v1411_v42 = vadd.f32 %v1410_v38, %v1409_v34  ;;  %v310_v31 = vld [vmem:[%s1653_s8 + $0x58] sm:$0xff] }
 0x126   : > { %v326_v33 = vld [vmem:[%s1653_s8 + $0xd8] sm:$0xff] }
 0x127   : > { %848 = vst [vmem:[%s1653_s8 + $0x20] sm:$0xff] %v816_v39  ;;  %864 = vst [vmem:[%s1653_s8 + $0xa0] sm:$0xff] %v832_v40  ;;  %v817_v43 = vadd.f32 %v1363_v41, %v304_v35  ;;  %v833_v44 = vadd.f32 %v1411_v42, %v320_v37 }
 0x129   : > { %849 = vst [vmem:[%s1653_s8 + $0x28] sm:$0xff] %v817_v43  ;;  %865 = vst [vmem:[%s1653_s8 + $0xa8] sm:$0xff] %v833_v44  ;;  %v1364_v45 = vpop.f32.mrb[12].mxu0  ;;  %v1412_v46 = vpop.f32.mrb[12].mxu1  ;;  %v311_v43 = vld [vmem:[%s1653_s8 + $0x60] sm:$0xff] }
 0x12a   : > { %v1365_v48 = vpop.f32.mrb[13].mxu0  ;;  %v1413_v50 = vpop.f32.mrb[13].mxu1 }
 0x12b   : > { %v1366_v51 = vadd.f32 %v1365_v48, %v1364_v45  ;;  %v1414_v52 = vadd.f32 %v1413_v50, %v1412_v46  ;;  %v1367_v53 = vpop.f32.mrb[14].mxu0  ;;  %v1415_v54 = vpop.f32.mrb[14].mxu1  ;;  %v327_v45 = vld [vmem:[%s1653_s8 + $0xe0] sm:$0xff] }
 0x12c   : > { %v1368_v56 = vpop.f32.mrb[15].mxu0  ;;  %v1416_v58 = vpop.f32.mrb[15].mxu1 }
 0x12d   : > { %v818_v59 = vadd.f32 %v1366_v51, %v305_v47  ;;  %v834_v60 = vadd.f32 %v1414_v52, %v321_v49  ;;  %v1369_v61 = vadd.f32 %v1368_v56, %v1367_v53  ;;  %v1417_v62 = vadd.f32 %v1416_v58, %v1415_v54  ;;  %v312_v51 = vld [vmem:[%s1653_s8 + $0x68] sm:$0xff] }
 0x12e   : > { %v328_v53 = vld [vmem:[%s1653_s8 + $0xe8] sm:$0xff] }
 0x12f   : > { %850 = vst [vmem:[%s1653_s8 + $0x30] sm:$0xff] %v818_v59  ;;  %866 = vst [vmem:[%s1653_s8 + $0xb0] sm:$0xff] %v834_v60  ;;  %v819_v63 = vadd.f32 %v1369_v61, %v306_v55  ;;  %v835_v0 = vadd.f32 %v1417_v62, %v322_v57 }
 0x131   : > { %851 = vst [vmem:[%s1653_s8 + $0x38] sm:$0xff] %v819_v63  ;;  %867 = vst [vmem:[%s1653_s8 + $0xb8] sm:$0xff] %v835_v0  ;;  %v1370_v1 = vpop.f32.mrb[16].mxu0  ;;  %v1418_v2 = vpop.f32.mrb[16].mxu1  ;;  %v313_v63 = vld [vmem:[%s1653_s8 + $0x70] sm:$0xff] }
 0x132   : > { %v1371_v4 = vpop.f32.mrb[17].mxu0  ;;  %v1419_v6 = vpop.f32.mrb[17].mxu1 }
 0x133   : > { %v1372_v7 = vadd.f32 %v1371_v4, %v1370_v1  ;;  %v1420_v8 = vadd.f32 %v1419_v6, %v1418_v2  ;;  %v1373_v9 = vpop.f32.mrb[18].mxu0  ;;  %v1421_v10 = vpop.f32.mrb[18].mxu1  ;;  %v329_v1 = vld [vmem:[%s1653_s8 + $0xf0] sm:$0xff] }
 0x134   : > { %v1374_v12 = vpop.f32.mrb[19].mxu0  ;;  %v1422_v14 = vpop.f32.mrb[19].mxu1 }
 0x135   : > { %v820_v15 = vadd.f32 %v1372_v7, %v307_v3  ;;  %v836_v16 = vadd.f32 %v1420_v8, %v323_v5  ;;  %v1375_v17 = vadd.f32 %v1374_v12, %v1373_v9  ;;  %v1423_v18 = vadd.f32 %v1422_v14, %v1421_v10  ;;  %v314_v7 = vld [vmem:[%s1653_s8 + $0x78] sm:$0xff] }
 0x136   : > { %v330_v9 = vld [vmem:[%s1653_s8 + $0xf8] sm:$0xff] }
 0x137   : > { %852 = vst [vmem:[%s1653_s8 + $0x40] sm:$0xff] %v820_v15  ;;  %868 = vst [vmem:[%s1653_s8 + $0xc0] sm:$0xff] %v836_v16  ;;  %v821_v19 = vadd.f32 %v1375_v17, %v308_v11  ;;  %v837_v20 = vadd.f32 %v1423_v18, %v324_v13 }
 0x139   : > { %853 = vst [vmem:[%s1653_s8 + $0x48] sm:$0xff] %v821_v19  ;;  %869 = vst [vmem:[%s1653_s8 + $0xc8] sm:$0xff] %v837_v20  ;;  %v1376_v21 = vpop.f32.mrb[20].mxu0  ;;  %v1424_v22 = vpop.f32.mrb[20].mxu1 }
 0x13a   : > { %v1377_v24 = vpop.f32.mrb[21].mxu0  ;;  %v1425_v26 = vpop.f32.mrb[21].mxu1 }
 0x13b   : > { %v1378_v27 = vadd.f32 %v1377_v24, %v1376_v21  ;;  %v1426_v28 = vadd.f32 %v1425_v26, %v1424_v22  ;;  %v1379_v29 = vpop.f32.mrb[22].mxu0  ;;  %v1427_v30 = vpop.f32.mrb[22].mxu1 }
 0x13c   : > { %v1380_v32 = vpop.f32.mrb[23].mxu0  ;;  %v1428_v34 = vpop.f32.mrb[23].mxu1 }
 0x13d   : > { %v822_v35 = vadd.f32 %v1378_v27, %v309_v23  ;;  %v838_v36 = vadd.f32 %v1426_v28, %v325_v25  ;;  %v1381_v37 = vadd.f32 %v1380_v32, %v1379_v29  ;;  %v1429_v38 = vadd.f32 %v1428_v34, %v1427_v30 }
 0x13f   : > { %854 = vst [vmem:[%s1653_s8 + $0x50] sm:$0xff] %v822_v35  ;;  %870 = vst [vmem:[%s1653_s8 + $0xd0] sm:$0xff] %v838_v36  ;;  %v823_v39 = vadd.f32 %v1381_v37, %v310_v31  ;;  %v839_v40 = vadd.f32 %v1429_v38, %v326_v33 }
 0x141   : > { %855 = vst [vmem:[%s1653_s8 + $0x58] sm:$0xff] %v823_v39  ;;  %871 = vst [vmem:[%s1653_s8 + $0xd8] sm:$0xff] %v839_v40  ;;  %v1382_v41 = vpop.f32.mrb[24].mxu0  ;;  %v1430_v42 = vpop.f32.mrb[24].mxu1 }
 0x142   : > { %v1383_v44 = vpop.f32.mrb[25].mxu0  ;;  %v1431_v46 = vpop.f32.mrb[25].mxu1 }
 0x143   : > { %v1384_v47 = vadd.f32 %v1383_v44, %v1382_v41  ;;  %v1432_v48 = vadd.f32 %v1431_v46, %v1430_v42  ;;  %v1385_v49 = vpop.f32.mrb[26].mxu0  ;;  %v1433_v50 = vpop.f32.mrb[26].mxu1 }
 0x144   : > { %v1386_v52 = vpop.f32.mrb[27].mxu0  ;;  %v1434_v54 = vpop.f32.mrb[27].mxu1 }
 0x145   : > { %v824_v55 = vadd.f32 %v1384_v47, %v311_v43  ;;  %v840_v56 = vadd.f32 %v1432_v48, %v327_v45  ;;  %v1387_v57 = vadd.f32 %v1386_v52, %v1385_v49  ;;  %v1435_v58 = vadd.f32 %v1434_v54, %v1433_v50 }
 0x147   : > { %856 = vst [vmem:[%s1653_s8 + $0x60] sm:$0xff] %v824_v55  ;;  %872 = vst [vmem:[%s1653_s8 + $0xe0] sm:$0xff] %v840_v56  ;;  %v825_v59 = vadd.f32 %v1387_v57, %v312_v51  ;;  %v841_v60 = vadd.f32 %v1435_v58, %v328_v53 }
 0x149   : > { %857 = vst [vmem:[%s1653_s8 + $0x68] sm:$0xff] %v825_v59  ;;  %873 = vst [vmem:[%s1653_s8 + $0xe8] sm:$0xff] %v841_v60  ;;  %v1388_v61 = vpop.f32.mrb[28].mxu0  ;;  %v1436_v62 = vpop.f32.mrb[28].mxu1 }
 0x14a   : > { %v1389_v0 = vpop.f32.mrb[29].mxu0  ;;  %v1437_v2 = vpop.f32.mrb[29].mxu1 }
 0x14b   : > { %v1390_v3 = vadd.f32 %v1389_v0, %v1388_v61  ;;  %v1438_v4 = vadd.f32 %v1437_v2, %v1436_v62  ;;  %v1391_v5 = vpop.f32.mrb[30].mxu0  ;;  %v1439_v6 = vpop.f32.mrb[30].mxu1 }
 0x14c   : > { %v1392_v8 = vpop.f32.mrb[31].mxu0  ;;  %v1440_v10 = vpop.f32.mrb[31].mxu1 }
 0x14d   : > { %v826_v11 = vadd.f32 %v1390_v3, %v313_v63  ;;  %v842_v12 = vadd.f32 %v1438_v4, %v329_v1  ;;  %v1393_v13 = vadd.f32 %v1392_v8, %v1391_v5  ;;  %v1441_v14 = vadd.f32 %v1440_v10, %v1439_v6 }
 0x14f   : > { %858 = vst [vmem:[%s1653_s8 + $0x70] sm:$0xff] %v826_v11  ;;  %874 = vst [vmem:[%s1653_s8 + $0xf0] sm:$0xff] %v842_v12  ;;  %v827_v15 = vadd.f32 %v1393_v13, %v314_v7  ;;  %v843_v16 = vadd.f32 %v1441_v14, %v330_v9 }
 0x151   : > { %859 = vst [vmem:[%s1653_s8 + $0x78] sm:$0xff] %v827_v15  ;;  %875 = vst [vmem:[%s1653_s8 + $0xf8] sm:$0xff] %v843_v16 }
 0x152 PF: > { %v913_v17 = vld [vmem:[%s1648_s5 + $0x10] sm:$0xff]  ;;  %v911_v18 = vld [vmem:[%s1648_s5] sm:$0xff]  ;;  %v1591_v19 = vmov 0   ;;  %v914_v20 = vld [vmem:[%s1648_s5 + $0x18] sm:$0xff] }
 0x153   : > { %1550 = vset.pattern.permute.xlu1 %v1591_v19  ;;  %1549 = vset.pattern.permute.xlu0 %v1591_v19  ;;  %v912_v21 = vld [vmem:[%s1648_s5 + $0x8] sm:$0xff]  ;;  %v915_v23 = vld [vmem:[%s1648_s5 + $0x20] sm:$0xff]  ;;  %v918_v24 = vld [vmem:[%s1648_s5 + $0x38] sm:$0xff] }
 0x154   : > { %955 = vperm.xlu1 %1550, %v913_v17   ;;  %945 = vperm.xlu0 %1549, %v911_v18   ;;  %v916_v22 = vld [vmem:[%s1648_s5 + $0x28] sm:$0xff]  ;;  %v917_v25 = vld [vmem:[%s1648_s5 + $0x30] sm:$0xff]  ;;  %v919_v27 = vld [vmem:[%s1648_s5 + $0x40] sm:$0xff] }
 0x155   : > { %v920_v26 = vld [vmem:[%s1648_s5 + $0x48] sm:$0xff]  ;;  %v922_v28 = vld [vmem:[%s1648_s5 + $0x58] sm:$0xff]  ;;  %v921_v29 = vld [vmem:[%s1648_s5 + $0x50] sm:$0xff] }
 0x156   : > { %v924_v30 = vld [vmem:[%s1648_s5 + $0x68] sm:$0xff]  ;;  %v923_v31 = vld [vmem:[%s1648_s5 + $0x60] sm:$0xff]  ;;  %v926_v32 = vld [vmem:[%s1648_s5 + $0x78] sm:$0xff] }
 0x157   : > { %v925_v33 = vld [vmem:[%s1648_s5 + $0x70] sm:$0xff]  ;;  %v928_v34 = vld [vmem:[%s1648_s5 + $0x88] sm:$0xff]  ;;  %v927_v35 = vld [vmem:[%s1648_s5 + $0x80] sm:$0xff] }
 0x158   : > { %960 = vperm.xlu1 %1550, %v914_v20   ;;  %950 = vperm.xlu0 %1549, %v912_v21   ;;  %v930_v36 = vld [vmem:[%s1648_s5 + $0x98] sm:$0xff]  ;;  %v929_v37 = vld [vmem:[%s1648_s5 + $0x90] sm:$0xff]  ;;  %v932_v38 = vld [vmem:[%s1648_s5 + $0xa8] sm:$0xff] }
 0x159   : > { %v931_v39 = vld [vmem:[%s1648_s5 + $0xa0] sm:$0xff]  ;;  %v934_v40 = vld [vmem:[%s1648_s5 + $0xb8] sm:$0xff]  ;;  %v933_v41 = vld [vmem:[%s1648_s5 + $0xb0] sm:$0xff] }
 0x15a   : > { %v936_v42 = vld [vmem:[%s1648_s5 + $0xc8] sm:$0xff]  ;;  %v935_v43 = vld [vmem:[%s1648_s5 + $0xc0] sm:$0xff]  ;;  %v938_v44 = vld [vmem:[%s1648_s5 + $0xd8] sm:$0xff] }
 0x15b   : > { %v937_v45 = vld [vmem:[%s1648_s5 + $0xd0] sm:$0xff]  ;;  %v940_v46 = vld [vmem:[%s1648_s5 + $0xe8] sm:$0xff]  ;;  %v939_v47 = vld [vmem:[%s1648_s5 + $0xe0] sm:$0xff] }
 0x15c   : > { %970 = vperm.xlu1 %1550, %v916_v22   ;;  %965 = vperm.xlu0 %1549, %v915_v23   ;;  %v942_v48 = vld [vmem:[%s1648_s5 + $0xf8] sm:$0xff]  ;;  %v941_v49 = vld [vmem:[%s1648_s5 + $0xf0] sm:$0xff]  ;;  %v879_v51 = vld [vmem:[%s1653_s8] sm:$0xff] }
 0x15d   : > { %v881_v50 = vld [vmem:[%s1653_s8 + $0x10] sm:$0xff]  ;;  %v882_v56 = vld [vmem:[%s1653_s8 + $0x18] sm:$0xff]  ;;  %v880_v57 = vld [vmem:[%s1653_s8 + $0x8] sm:$0xff] }
 0x15e   : > { %v884_v62 = vld [vmem:[%s1653_s8 + $0x28] sm:$0xff]  ;;  %v883_v63 = vld [vmem:[%s1653_s8 + $0x20] sm:$0xff]  ;;  %v886_v4 = vld [vmem:[%s1653_s8 + $0x38] sm:$0xff] }
 0x15f   : > { %v885_v5 = vld [vmem:[%s1653_s8 + $0x30] sm:$0xff]  ;;  %v888_v10 = vld [vmem:[%s1653_s8 + $0x48] sm:$0xff]  ;;  %v887_v11 = vld [vmem:[%s1653_s8 + $0x40] sm:$0xff] }
 0x160   : > { %980 = vperm.xlu1 %1550, %v918_v24   ;;  %975 = vperm.xlu0 %1549, %v917_v25   ;;  %v890_v16 = vld [vmem:[%s1653_s8 + $0x58] sm:$0xff]  ;;  %v889_v17 = vld [vmem:[%s1653_s8 + $0x50] sm:$0xff]  ;;  %v892_v22 = vld [vmem:[%s1653_s8 + $0x68] sm:$0xff] }
 0x161   : > { %v891_v23 = vld [vmem:[%s1653_s8 + $0x60] sm:$0xff] }
 0x164   : > { %990 = vperm.xlu1 %1550, %v920_v26   ;;  %985 = vperm.xlu0 %1549, %v919_v27  }
 0x168   : > { %1000 = vperm.xlu1 %1550, %v922_v28   ;;  %995 = vperm.xlu0 %1549, %v921_v29   ;;  %v894_v28 = vld [vmem:[%s1653_s8 + $0x78] sm:$0xff]  ;;  %v893_v29 = vld [vmem:[%s1653_s8 + $0x70] sm:$0xff] }
 0x16c   : > { %1010 = vperm.xlu1 %1550, %v924_v30   ;;  %1005 = vperm.xlu0 %1549, %v923_v31  }
 0x170   : > { %1020 = vperm.xlu1 %1550, %v926_v32   ;;  %1015 = vperm.xlu0 %1549, %v925_v33  }
 0x174   : > { %1030 = vperm.xlu1 %1550, %v928_v34   ;;  %1025 = vperm.xlu0 %1549, %v927_v35   ;;  %v896_v34 = vld [vmem:[%s1653_s8 + $0x88] sm:$0xff]  ;;  %v895_v35 = vld [vmem:[%s1653_s8 + $0x80] sm:$0xff] }
 0x178   : > { %1040 = vperm.xlu1 %1550, %v930_v36   ;;  %1035 = vperm.xlu0 %1549, %v929_v37  }
 0x17c   : > { %1050 = vperm.xlu1 %1550, %v932_v38   ;;  %1045 = vperm.xlu0 %1549, %v931_v39  }
 0x180   : > { %1060 = vperm.xlu1 %1550, %v934_v40   ;;  %1055 = vperm.xlu0 %1549, %v933_v41   ;;  %v898_v40 = vld [vmem:[%s1653_s8 + $0x98] sm:$0xff]  ;;  %v897_v41 = vld [vmem:[%s1653_s8 + $0x90] sm:$0xff] }
 0x184   : > { %1070 = vperm.xlu1 %1550, %v936_v42   ;;  %1065 = vperm.xlu0 %1549, %v935_v43  }
 0x188   : > { %1080 = vperm.xlu1 %1550, %v938_v44   ;;  %1075 = vperm.xlu0 %1549, %v937_v45  }
 0x18c   : > { %1090 = vperm.xlu1 %1550, %v940_v46   ;;  %1085 = vperm.xlu0 %1549, %v939_v47   ;;  %v900_v46 = vld [vmem:[%s1653_s8 + $0xa8] sm:$0xff]  ;;  %v899_v47 = vld [vmem:[%s1653_s8 + $0xa0] sm:$0xff] }
 0x190   : > { %1100 = vperm.xlu1 %1550, %v942_v48   ;;  %1095 = vperm.xlu0 %1549, %v941_v49  }
 0x1d3   : > { %v956_v52 = vpop.permute.xlu1 %955  ;;  %v946_v53 = vpop.permute.xlu0 %945 }
 0x1d4   : > { %v1105_v54 = vmul.f32 %v956_v52, %v881_v50  ;;  %v1103_v55 = vmul.f32 %v946_v53, %v879_v51  ;;  %v902_v52 = vld [vmem:[%s1653_s8 + $0xb8] sm:$0xff]  ;;  %v901_v53 = vld [vmem:[%s1653_s8 + $0xb0] sm:$0xff] }
 0x1d6   : > { %1137 = vst [vmem:[%s1653_s8 + $0x10] sm:$0xff] %v1105_v54  ;;  %1135 = vst [vmem:[%s1653_s8] sm:$0xff] %v1103_v55 }
 0x1d7   : > { %v961_v58 = vpop.permute.xlu1 %960  ;;  %v951_v59 = vpop.permute.xlu0 %950 }
 0x1d8   : > { %v1106_v60 = vmul.f32 %v961_v58, %v882_v56  ;;  %v1104_v61 = vmul.f32 %v951_v59, %v880_v57  ;;  %v904_v58 = vld [vmem:[%s1653_s8 + $0xc8] sm:$0xff]  ;;  %v903_v59 = vld [vmem:[%s1653_s8 + $0xc0] sm:$0xff] }
 0x1da   : > { %1138 = vst [vmem:[%s1653_s8 + $0x18] sm:$0xff] %v1106_v60  ;;  %1136 = vst [vmem:[%s1653_s8 + $0x8] sm:$0xff] %v1104_v61 }
 0x1db   : > { %v971_v0 = vpop.permute.xlu1 %970  ;;  %v966_v1 = vpop.permute.xlu0 %965 }
 0x1dc   : > { %v1108_v2 = vmul.f32 %v971_v0, %v884_v62  ;;  %v1107_v3 = vmul.f32 %v966_v1, %v883_v63  ;;  %v906_v0 = vld [vmem:[%s1653_s8 + $0xd8] sm:$0xff]  ;;  %v905_v1 = vld [vmem:[%s1653_s8 + $0xd0] sm:$0xff] }
 0x1de   : > { %1140 = vst [vmem:[%s1653_s8 + $0x28] sm:$0xff] %v1108_v2  ;;  %1139 = vst [vmem:[%s1653_s8 + $0x20] sm:$0xff] %v1107_v3 }
 0x1df   : > { %v981_v6 = vpop.permute.xlu1 %980  ;;  %v976_v7 = vpop.permute.xlu0 %975 }
 0x1e0   : > { %v1110_v8 = vmul.f32 %v981_v6, %v886_v4  ;;  %v1109_v9 = vmul.f32 %v976_v7, %v885_v5  ;;  %v908_v6 = vld [vmem:[%s1653_s8 + $0xe8] sm:$0xff]  ;;  %v907_v7 = vld [vmem:[%s1653_s8 + $0xe0] sm:$0xff] }
 0x1e2   : > { %1142 = vst [vmem:[%s1653_s8 + $0x38] sm:$0xff] %v1110_v8  ;;  %1141 = vst [vmem:[%s1653_s8 + $0x30] sm:$0xff] %v1109_v9 }
 0x1e3   : > { %v991_v12 = vpop.permute.xlu1 %990  ;;  %v986_v13 = vpop.permute.xlu0 %985 }
 0x1e4   : > { %v1112_v14 = vmul.f32 %v991_v12, %v888_v10  ;;  %v1111_v15 = vmul.f32 %v986_v13, %v887_v11  ;;  %v910_v12 = vld [vmem:[%s1653_s8 + $0xf8] sm:$0xff]  ;;  %v909_v13 = vld [vmem:[%s1653_s8 + $0xf0] sm:$0xff] }
 0x1e6   : > { %1144 = vst [vmem:[%s1653_s8 + $0x48] sm:$0xff] %v1112_v14  ;;  %1143 = vst [vmem:[%s1653_s8 + $0x40] sm:$0xff] %v1111_v15 }
 0x1e7   : > { %v1001_v18 = vpop.permute.xlu1 %1000  ;;  %v996_v19 = vpop.permute.xlu0 %995 }
 0x1e8   : > { %v1114_v20 = vmul.f32 %v1001_v18, %v890_v16  ;;  %v1113_v21 = vmul.f32 %v996_v19, %v889_v17 }
 0x1ea   : > { %1146 = vst [vmem:[%s1653_s8 + $0x58] sm:$0xff] %v1114_v20  ;;  %1145 = vst [vmem:[%s1653_s8 + $0x50] sm:$0xff] %v1113_v21 }
 0x1eb   : > { %v1011_v24 = vpop.permute.xlu1 %1010  ;;  %v1006_v25 = vpop.permute.xlu0 %1005 }
 0x1ec   : > { %v1116_v26 = vmul.f32 %v1011_v24, %v892_v22  ;;  %v1115_v27 = vmul.f32 %v1006_v25, %v891_v23 }
 0x1ee   : > { %1148 = vst [vmem:[%s1653_s8 + $0x68] sm:$0xff] %v1116_v26  ;;  %1147 = vst [vmem:[%s1653_s8 + $0x60] sm:$0xff] %v1115_v27 }
 0x1ef   : > { %v1021_v30 = vpop.permute.xlu1 %1020  ;;  %v1016_v31 = vpop.permute.xlu0 %1015 }
 0x1f0   : > { %v1118_v32 = vmul.f32 %v1021_v30, %v894_v28  ;;  %v1117_v33 = vmul.f32 %v1016_v31, %v893_v29 }
 0x1f2   : > { %1150 = vst [vmem:[%s1653_s8 + $0x78] sm:$0xff] %v1118_v32  ;;  %1149 = vst [vmem:[%s1653_s8 + $0x70] sm:$0xff] %v1117_v33 }
 0x1f3   : > { %v1031_v36 = vpop.permute.xlu1 %1030  ;;  %v1026_v37 = vpop.permute.xlu0 %1025 }
 0x1f4   : > { %v1120_v38 = vmul.f32 %v1031_v36, %v896_v34  ;;  %v1119_v39 = vmul.f32 %v1026_v37, %v895_v35 }
 0x1f6   : > { %1152 = vst [vmem:[%s1653_s8 + $0x88] sm:$0xff] %v1120_v38  ;;  %1151 = vst [vmem:[%s1653_s8 + $0x80] sm:$0xff] %v1119_v39 }
 0x1f7   : > { %v1041_v42 = vpop.permute.xlu1 %1040  ;;  %v1036_v43 = vpop.permute.xlu0 %1035 }
 0x1f8   : > { %v1122_v44 = vmul.f32 %v1041_v42, %v898_v40  ;;  %v1121_v45 = vmul.f32 %v1036_v43, %v897_v41 }
 0x1fa   : > { %1154 = vst [vmem:[%s1653_s8 + $0x98] sm:$0xff] %v1122_v44  ;;  %1153 = vst [vmem:[%s1653_s8 + $0x90] sm:$0xff] %v1121_v45 }
 0x1fb   : > { %v1051_v48 = vpop.permute.xlu1 %1050  ;;  %v1046_v49 = vpop.permute.xlu0 %1045 }
 0x1fc   : > { %v1124_v50 = vmul.f32 %v1051_v48, %v900_v46  ;;  %v1123_v51 = vmul.f32 %v1046_v49, %v899_v47 }
 0x1fe   : > { %1156 = vst [vmem:[%s1653_s8 + $0xa8] sm:$0xff] %v1124_v50  ;;  %1155 = vst [vmem:[%s1653_s8 + $0xa0] sm:$0xff] %v1123_v51 }
 0x1ff   : > { %v1061_v54 = vpop.permute.xlu1 %1060  ;;  %v1056_v55 = vpop.permute.xlu0 %1055 }
 0x200   : > { %v1126_v56 = vmul.f32 %v1061_v54, %v902_v52  ;;  %v1125_v57 = vmul.f32 %v1056_v55, %v901_v53 }
 0x202   : > { %1158 = vst [vmem:[%s1653_s8 + $0xb8] sm:$0xff] %v1126_v56  ;;  %1157 = vst [vmem:[%s1653_s8 + $0xb0] sm:$0xff] %v1125_v57 }
 0x203   : > { %v1071_v60 = vpop.permute.xlu1 %1070  ;;  %v1066_v61 = vpop.permute.xlu0 %1065 }
 0x204   : > { %v1128_v62 = vmul.f32 %v1071_v60, %v904_v58  ;;  %v1127_v63 = vmul.f32 %v1066_v61, %v903_v59 }
 0x206   : > { %1160 = vst [vmem:[%s1653_s8 + $0xc8] sm:$0xff] %v1128_v62  ;;  %1159 = vst [vmem:[%s1653_s8 + $0xc0] sm:$0xff] %v1127_v63 }
 0x207   : > { %v1081_v2 = vpop.permute.xlu1 %1080  ;;  %v1076_v3 = vpop.permute.xlu0 %1075 }
 0x208   : > { %v1130_v4 = vmul.f32 %v1081_v2, %v906_v0  ;;  %v1129_v5 = vmul.f32 %v1076_v3, %v905_v1 }
 0x20a   : > { %1162 = vst [vmem:[%s1653_s8 + $0xd8] sm:$0xff] %v1130_v4  ;;  %1161 = vst [vmem:[%s1653_s8 + $0xd0] sm:$0xff] %v1129_v5 }
 0x20b   : > { %v1091_v8 = vpop.permute.xlu1 %1090  ;;  %v1086_v9 = vpop.permute.xlu0 %1085 }
 0x20c   : > { %v1132_v10 = vmul.f32 %v1091_v8, %v908_v6  ;;  %v1131_v11 = vmul.f32 %v1086_v9, %v907_v7 }
 0x20e   : > { %1164 = vst [vmem:[%s1653_s8 + $0xe8] sm:$0xff] %v1132_v10  ;;  %1163 = vst [vmem:[%s1653_s8 + $0xe0] sm:$0xff] %v1131_v11 }
 0x20f   : > { %v1101_v14 = vpop.permute.xlu1 %1100  ;;  %v1096_v15 = vpop.permute.xlu0 %1095 }
 0x210   : > { %v1134_v16 = vmul.f32 %v1101_v14, %v910_v12  ;;  %v1133_v17 = vmul.f32 %v1096_v15, %v909_v13 }
 0x212   : > { %1166 = vst [vmem:[%s1653_s8 + $0xf8] sm:$0xff] %v1134_v16  ;;  %1165 = vst [vmem:[%s1653_s8 + $0xf0] sm:$0xff] %v1133_v17 }
 0x213 PF: > { %s20_s22 = sadd.s32 1, %s1587_s22   ;;  %s1942_s20 = smov %s1583_s21 }
 0x214   : > { %p17_p11 = scmp.ge.s32.totalorder %s20_s22, 4   ;;  %s1943_s21 = smov %s1945_s0 }
 0x216   :  { %19 = sbr.rel (!%p17_p11) target bundleno = 17 (0x11), region = 80 }

</bundles_post_ra>
